<compile_context>
chip_gen: v6e
topology: v6e:2x2x1
jax: 0.10.0
libtpu: 0.0.40
codegen_flags: <defaults>
</compile_context>

<pallas_src>
import functools
from itertools import combinations

import jax
import jax.numpy as jnp
import numpy as np
from jax.experimental import pallas as pl
from jax.experimental.pallas import tpu as pltpu


# ----------------------------------------------------------------------------
# Kernel
# ----------------------------------------------------------------------------
def _insert_one_bits(j, positions):
    """Insert constant 1-bits into integer j at the given ascending positions."""
    for pos in positions:
        low = j & ((1 << pos) - 1)
        j = ((j >> pos) << (pos + 1)) | (1 << pos) | low
    return j


def _cphase_kernel(cs_ref, x_ref, o_ref, *, mask_shifts, tile_lanes, ins_positions):
    """Conditional rotation by exp(i*theta) on a stacked (2, B, T) re/im tile.

    cs_ref: (2, B, 1) float32 -- [cos(theta_b); sin(theta_b)]
    x_ref / o_ref: (2, B, T) float32 -- [re; im] planes
    mask_shifts: static bit positions of S that must be 1 (checked in-kernel);
                 bits hoisted into the grid index_map never appear here.
    ins_positions: static block-space positions of the hoisted 1-bits (same math
                   as the index_map), used to reconstruct the true S offset.
    """
    c = cs_ref[0]                       # (B, 1), broadcasts over lanes
    s = cs_ref[1]
    re = x_ref[0]                       # (B, T)
    im = x_ref[1]
    rot_re = re * c - im * s
    rot_im = re * s + im * c

    if mask_shifts:
        # True S-offset of this tile: replay the index_map's bit insertion on the
        # grid counter, so the mask is valid for masked bits both below AND above
        # log2(tile_lanes).
        blk = _insert_one_bits(pl.program_id(0), ins_positions)
        base = blk * tile_lanes
        T = x_ref.shape[2]
        idx = jax.lax.broadcasted_iota(jnp.int32, (1, T), 1) + base
        pred = idx >> mask_shifts[0]
        for b in mask_shifts[1:]:
            pred &= idx >> b
        mask = (pred & 1) != 0          # (1, T), broadcasts over sublanes
        o_ref[0] = jnp.where(mask, rot_re, re)
        o_ref[1] = jnp.where(mask, rot_im, im)
    else:
        # Every element of this tile has control=target=1: unconditional rotate.
        o_ref[0] = rot_re
        o_ref[1] = rot_im


# ----------------------------------------------------------------------------
# Tiling / hoisting policy
# ----------------------------------------------------------------------------
_STEP_OVERHEAD_S = 0.4e-6        # fixed cost per grid step
_HBM_BW_BYTES_S = 1.0e12         # representative; only relative plan cost matters
_TARGET_MIN_BLOCKS = 8           # give megacore (v7x: 2 TCs) work to shard
_PARALLEL_TILE_FLOOR_LOG = 14    # but never shrink tiles below 16384 lanes for it


def _round_up(x, m):
    return -(-x // m) * m


def _vmem_limit_bytes():
    """Generation-aware VMEM ceiling (v7x: 64 MiB physical -> ~48 MiB usable)."""
    cap = 128 * 1024 * 1024
    try:
        cap = int(pltpu.get_tpu_info().vmem_capacity_bytes)
    except Exception:
        pass
    return min(64 * 1024 * 1024, (cap * 3) // 4)


def _choose_plan(S, batch, bit_positions, vmem_limit):
    """Pick (tile_log, hoisted_bits, masked_bits, num_blocks) for the S axis."""
    n_bits = S.bit_length() - 1          # log2(S); S is a power of two
    bits = tuple(sorted(set(int(b) for b in bit_positions)))

    if n_bits <= 7:
        # Single block covering all of S; everything handled by the in-kernel mask.
        return n_bits, (), bits, 1

    # VMEM accounting with sublane padding: a (2, batch, tile) f32 block pads the
    # batch dim up to 8 sublanes; input + output, each double buffered.
    sub = _round_up(batch, 8)
    per_lane_bytes = 2 * sub * 4 * 2 * 2
    budget = max(per_lane_bytes * 128, vmem_limit - (4 << 20))  # headroom for cos/sin + scratch
    budget_log = min(n_bits, max(7, (budget // per_lane_bytes).bit_length() - 1))

    # Explicitly compare hoist plans: hoisting bit b skips half the blocks but
    # forces tile_log <= b; masking keeps the big tile but touches more bytes.
    eligible = [b for b in bits if b >= 7]
    plans = [()]
    for r in range(1, len(eligible) + 1):
        plans.extend(combinations(eligible, r))

    best = None
    for H in plans:
        tile_log = min([budget_log] + list(H))
        blocks = 1 << (n_bits - tile_log - len(H))
        bytes_rw = 2 * (2 * batch * (1 << tile_log) * 4)   # HBM read + write per block
        cost = blocks * (_STEP_OVERHEAD_S + bytes_rw / _HBM_BW_BYTES_S)
        if best is None or cost < best[0]:
            best = (cost, tile_log, H)
    _, tile_log, hoisted = best

    # Megacore: keep several parallel blocks for v7x's 2 TensorCores, but never
    # at the price of tiny tiles (per-step overhead would dominate again).
    while (1 << (n_bits - tile_log - len(hoisted))) < _TARGET_MIN_BLOCKS \
            and tile_log > _PARALLEL_TILE_FLOOR_LOG:
        tile_log -= 1

    hoisted = tuple(sorted(hoisted))
    masked = tuple(b for b in bits if b not in hoisted)
    # Invariant required by the grid bit-insertion: hoisted bits are block-aligned.
    assert all(b >= tile_log for b in hoisted)
    num_blocks = 1 << (n_bits - tile_log - len(hoisted))
    return tile_log, hoisted, masked, num_blocks


# ----------------------------------------------------------------------------
# Persistent-planes API (intended per-gate entry point)
# ----------------------------------------------------------------------------
def cphase_apply_planes(planes, theta, qubits, n_qubits):
    """Apply CPHASE to the persistent (2, batch, S) float32 re/im planes.

    A circuit simulator should keep its state in this representation across
    gates and only convert to/from the complex tensor layout once per circuit
    (state_to_planes / planes_to_state).
    """
    planes = planes.astype(jnp.float32)
    two, batch, S = planes.shape
    assert two == 2 and S == 2 ** n_qubits
    shift_c = n_qubits - 1 - int(qubits[0])
    shift_t = n_qubits - 1 - int(qubits[1])
    assert shift_c != shift_t, "control and target qubits must differ"

    vmem_limit = _vmem_limit_bytes()
    tile_log, hoisted, masked, num_blocks = _choose_plan(
        S, batch, (shift_c, shift_t), vmem_limit)
    tile_s = 1 << tile_log

    # cos/sin computed once per gate (EUP work on `batch` values), stacked so the
    # kernel gets a single tiny constant-index input.
    theta = theta.astype(jnp.float32)
    cs = jnp.stack([jnp.cos(theta), jnp.sin(theta)], axis=0).reshape(2, batch, 1)

    # Block-space positions where a constant 1-bit is inserted so the grid only
    # visits blocks whose hoisted control/target bits are set.
    ins_positions = tuple(sorted(b - tile_log for b in hoisted))

    def s_block_index(i):
        return _insert_one_bits(i, ins_positions)

    # NOTE: pipeline_mode=pl.Buffered(3) was considered for the strided hoisted
    # case; default double buffering showed no exposed DMA gap at these tile sizes.
    state_spec = pl.BlockSpec((2, batch, tile_s), lambda i: (0, 0, s_block_index(i)))
    cs_spec = pl.BlockSpec((2, batch, 1), lambda i: (0, 0, 0))

    kernel = functools.partial(_cphase_kernel, mask_shifts=masked,
                               tile_lanes=tile_s, ins_positions=ins_positions)

    extra = {}
    if hoisted:
        # Grid skips unaffected blocks; alias the output onto the planes input so
        # untouched amplitudes pass through without HBM traffic (inputs: cs=0,
        # planes=1 -> output 0).  Best when `planes` is dead/donated, as for an
        # intermediate state in a jitted gate chain.
        extra["input_output_aliases"] = {1: 0}

    return pl.pallas_call(
        kernel,
        grid=(num_blocks,),
        in_specs=[cs_spec, state_spec],
        out_specs=state_spec,
        out_shape=jax.ShapeDtypeStruct((2, batch, S), jnp.float32),
        compiler_params=pltpu.CompilerParams(
            dimension_semantics=("parallel",),
            vmem_limit_bytes=vmem_limit,
        ),
        **extra,
    )(cs, planes)


# ----------------------------------------------------------------------------
# Circuit-boundary converters + torch-compatible forward
# ----------------------------------------------------------------------------
def state_to_planes(state):
    """[2]*n + [batch] complex -> (2, batch, S) float32 planes (circuit boundary)."""
    batch = state.shape[-1]
    S = int(np.prod(state.shape[:-1]))
    flat = jnp.moveaxis(state.reshape(S, batch), 0, 1)       # (batch, S): one transpose
    return jnp.stack([jnp.real(flat), jnp.imag(flat)], axis=0).astype(jnp.float32)


def planes_to_state(planes, n_qubits):
    """(2, batch, S) float32 planes -> [2]*n + [batch] complex64 (circuit boundary)."""
    batch = planes.shape[1]
    cplx = (planes[0] + 1j * planes[1]).astype(jnp.complex64)  # (batch, S)
    return jnp.moveaxis(cplx, 0, 1).reshape((2,) * n_qubits + (batch,))


def cphase_forward(state, thetas, qubits, n_qubits):
    """JAX/Pallas equivalent of CPHASE(qubits, n_qubits).forward(state, thetas).

    The complex<->planes conversion here exists only to mirror the torch module's
    complex interface for a single gate; multi-gate circuits should convert once
    and chain cphase_apply_planes on the planes (see __main__).
    """
    theta = thetas[0] if thetas.ndim == 2 else thetas   # thetas.squeeze(0) for (1, batch)
    planes = state_to_planes(state)
    planes = cphase_apply_planes(planes, theta, qubits, n_qubits)
    return planes_to_state(planes, n_qubits)


# ----------------------------------------------------------------------------
# Pure-JAX reference for verification
# ----------------------------------------------------------------------------
def _cphase_reference(state, thetas, qubits, n_qubits):
    theta = thetas[0] if thetas.ndim == 2 else thetas
    S = 2 ** n_qubits
    batch = theta.shape[0]
    flat = state.reshape(S, batch).astype(jnp.complex64)
    idx = jnp.arange(S)
    bit_c = (idx >> (n_qubits - 1 - int(qubits[0]))) & 1
    bit_t = (idx >> (n_qubits - 1 - int(qubits[1]))) & 1
    mask = ((bit_c & bit_t) == 1)[:, None]
    phase = jnp.exp(1j * theta.astype(jnp.float32))[None, :].astype(jnp.complex64)
    out = jnp.where(mask, flat * phase, flat)
    return out.reshape(state.shape)


if __name__ == "__main__":
    key = jax.random.PRNGKey(0)

    def make_state(k, n_qubits, batch):
        k1, k2 = jax.random.split(k)
        shape = tuple([2] * n_qubits + [batch])
        sre = jax.random.normal(k1, shape, dtype=jnp.float32)
        sim = jax.random.normal(k2, shape, dtype=jnp.float32)
        st = (sre + 1j * sim).astype(jnp.complex64)
        norm = jnp.sqrt(jnp.sum(jnp.abs(st) ** 2,
                                axis=tuple(range(n_qubits)), keepdims=True))
        return st / norm.astype(jnp.complex64)

    # (n_qubits, [control, target], batch)
    cases = [
        (4,  [0, 2], 2),    # tiny state: single block, batch < 8 (sublane padding)
        (10, [0, 2], 8),    # hoist bit 9 into the grid, mask bit 7 in-kernel
        (12, [0, 11], 8),   # hoist high bit, mask the lane-level bit 0
        (12, [3, 4], 4),    # both bits low: planner keeps the big tile, masks both
        (14, [0, 1], 8),    # both bits high: fully hoisted, unconditional rotate on 25%
        (10, [1, 5], 1),    # batch=1: padded-sublane VMEM accounting
        (10, [0, 5], 3),    # non-power-of-two batch with a hoisted bit
    ]
    for case_idx, (n_qubits, qubits, batch) in enumerate(cases):
        key, k_state, k_theta = jax.random.split(key, 3)
        state = make_state(k_state, n_qubits, batch)
        thetas = jax.random.uniform(k_theta, (batch,), dtype=jnp.float32,
                                    minval=0.0, maxval=2.0 * np.pi)
        if case_idx == 0:
            thetas = thetas.reshape(1, batch)   # exercise the (1, batch) torch path
        out = jax.block_until_ready(cphase_forward(state, thetas, qubits, n_qubits))
        ref = _cphase_reference(state, thetas, qubits, n_qubits)
        np.testing.assert_allclose(np.asarray(out), np.asarray(ref),
                                   rtol=1e-5, atol=1e-5)

    # Persistent-planes gate chain: the complex<->planes conversion happens once
    # per circuit; per gate only the kernel's own HBM traffic remains, and the
    # donated planes buffer lets hoisted gates alias the state in place.
    n_qubits, batch = 10, 4
    chain_qubits = ((0, 2), (3, 9), (1, 4))
    key, k_state, k_theta = jax.random.split(key, 3)
    state = make_state(k_state, n_qubits, batch)
    chain_thetas = jax.random.uniform(k_theta, (len(chain_qubits), batch),
                                      dtype=jnp.float32, minval=0.0,
                                      maxval=2.0 * np.pi)

    @functools.partial(jax.jit, static_argnames=("qubits_list", "nq"),
                       donate_argnums=(0,))
    def run_chain(planes, thetas, qubits_list, nq):
        for g, qs in enumerate(qubits_list):
            planes = cphase_apply_planes(planes, thetas[g], qs, nq)
        return planes

    planes = state_to_planes(state)
    planes = run_chain(planes, chain_thetas, qubits_list=chain_qubits, nq=n_qubits)
    out_chain = jax.block_until_ready(planes_to_state(planes, n_qubits))

    ref_chain = state
    for g, qs in enumerate(chain_qubits):
        ref_chain = _cphase_reference(ref_chain, chain_thetas[g], qs, n_qubits)
    np.testing.assert_allclose(np.asarray(out_chain), np.asarray(ref_chain),
                               rtol=1e-5, atol=1e-5)

    print("KERNEL_OK")
</pallas_src>

<mosaic_0001>
module attributes {stable_mosaic.version = 11 : i64} {
  func.func @_cphase_kernel(%arg0: i32, %arg1: memref<2x2x1xf32, #tpu.memory_space<vmem>>, %arg2: memref<2x2x16xf32, #tpu.memory_space<vmem>>, %arg3: memref<2x2x16xf32, #tpu.memory_space<vmem>>) attributes {dimension_semantics = [#tpu.dimension_semantics<parallel>], iteration_bounds = array<i64: 1>, scalar_prefetch = 0 : i64, scratch_operands = 0 : i64, tpu.core_type = #tpu.core_type<tc>, window_params = [{pipeline_mode = #tpu.pipeline_mode<synchronous>, transform_indices = @transform_0, window_bounds = array<i64: 2, 2, 1>}, {transform_indices = @transform_1, window_bounds = array<i64: 2, 2, 16>}, {transform_indices = @transform_2, window_bounds = array<i64: 2, 2, 16>}]} {
    %c0 = arith.constant 0 : index
    %c0_0 = arith.constant 0 : index
    %c0_1 = arith.constant 0 : index
    %0 = vector.load %arg1[%c0, %c0_0, %c0_1] : memref<2x2x1xf32, #tpu.memory_space<vmem>>, vector<1x2x1xf32>
    %1 = vector.shape_cast %0 : vector<1x2x1xf32> to vector<2x1xf32>
    %c1 = arith.constant 1 : index
    %c0_2 = arith.constant 0 : index
    %c0_3 = arith.constant 0 : index
    %2 = vector.load %arg1[%c1, %c0_2, %c0_3] : memref<2x2x1xf32, #tpu.memory_space<vmem>>, vector<1x2x1xf32>
    %3 = vector.shape_cast %2 : vector<1x2x1xf32> to vector<2x1xf32>
    %c0_4 = arith.constant 0 : index
    %c0_5 = arith.constant 0 : index
    %c0_6 = arith.constant 0 : index
    %4 = vector.load %arg2[%c0_4, %c0_5, %c0_6] : memref<2x2x16xf32, #tpu.memory_space<vmem>>, vector<1x2x16xf32>
    %5 = vector.shape_cast %4 : vector<1x2x16xf32> to vector<2x16xf32>
    %c1_7 = arith.constant 1 : index
    %c0_8 = arith.constant 0 : index
    %c0_9 = arith.constant 0 : index
    %6 = vector.load %arg2[%c1_7, %c0_8, %c0_9] : memref<2x2x16xf32, #tpu.memory_space<vmem>>, vector<1x2x16xf32>
    %7 = vector.shape_cast %6 : vector<1x2x16xf32> to vector<2x16xf32>
    %8 = vector.broadcast %1 : vector<2x1xf32> to vector<2x16xf32>
    %9 = arith.mulf %5, %8 : vector<2x16xf32>
    %10 = vector.broadcast %3 : vector<2x1xf32> to vector<2x16xf32>
    %11 = arith.mulf %7, %10 : vector<2x16xf32>
    %12 = arith.subf %9, %11 : vector<2x16xf32>
    %13 = vector.broadcast %3 : vector<2x1xf32> to vector<2x16xf32>
    %14 = arith.mulf %5, %13 : vector<2x16xf32>
    %15 = vector.broadcast %1 : vector<2x1xf32> to vector<2x16xf32>
    %16 = arith.mulf %7, %15 : vector<2x16xf32>
    %17 = arith.addf %14, %16 : vector<2x16xf32>
    %c16_i32 = arith.constant 16 : i32
    %18 = arith.muli %arg0, %c16_i32 : i32
    %19 = tpu.iota {dimensions = array<i32: 1>} : vector<1x16xi32>
    %20 = vector.broadcast %18 : i32 to vector<1x16xi32>
    %21 = arith.addi %19, %20 : vector<1x16xi32>
    %c1_i32 = arith.constant 1 : i32
    %22 = vector.broadcast %c1_i32 : i32 to vector<1x16xi32>
    %23 = arith.shrsi %21, %22 : vector<1x16xi32>
    %c3_i32 = arith.constant 3 : i32
    %24 = vector.broadcast %c3_i32 : i32 to vector<1x16xi32>
    %25 = arith.shrsi %21, %24 : vector<1x16xi32>
    %26 = arith.andi %23, %25 : vector<1x16xi32>
    %c1_i32_10 = arith.constant 1 : i32
    %27 = vector.broadcast %c1_i32_10 : i32 to vector<1x16xi32>
    %28 = arith.andi %26, %27 : vector<1x16xi32>
    %c0_i32 = arith.constant 0 : i32
    %29 = vector.broadcast %c0_i32 : i32 to vector<1x16xi32>
    %30 = arith.cmpi ne, %28, %29 : vector<1x16xi32>
    %31 = vector.shape_cast %30 : vector<1x16xi1> to vector<1x16xi1>
    %32 = vector.broadcast %31 : vector<1x16xi1> to vector<2x16xi1>
    %33 = arith.select %32, %12, %5 : vector<2x16xi1>, vector<2x16xf32>
    %c0_11 = arith.constant 0 : index
    %c0_12 = arith.constant 0 : index
    %c0_13 = arith.constant 0 : index
    %34 = vector.load %arg3[%c0_11, %c0_12, %c0_13] : memref<2x2x16xf32, #tpu.memory_space<vmem>>, vector<1x2x16xf32>
    %35 = vector.shape_cast %34 : vector<1x2x16xf32> to vector<2x16xf32>
    %36 = vector.shape_cast %33 : vector<2x16xf32> to vector<1x2x16xf32>
    tpu.vector_store %arg3[%c0_11, %c0_12, %c0_13], %36 {strides = array<i32>} : memref<2x2x16xf32, #tpu.memory_space<vmem>>, vector<1x2x16xf32>,
    %37 = vector.shape_cast %30 : vector<1x16xi1> to vector<1x16xi1>
    %38 = vector.broadcast %37 : vector<1x16xi1> to vector<2x16xi1>
    %39 = arith.select %38, %17, %7 : vector<2x16xi1>, vector<2x16xf32>
    %c1_14 = arith.constant 1 : index
    %c0_15 = arith.constant 0 : index
    %c0_16 = arith.constant 0 : index
    %40 = vector.load %arg3[%c1_14, %c0_15, %c0_16] : memref<2x2x16xf32, #tpu.memory_space<vmem>>, vector<1x2x16xf32>
    %41 = vector.shape_cast %40 : vector<1x2x16xf32> to vector<2x16xf32>
    %42 = vector.shape_cast %39 : vector<2x16xf32> to vector<1x2x16xf32>
    tpu.vector_store %arg3[%c1_14, %c0_15, %c0_16], %42 {strides = array<i32>} : memref<2x2x16xf32, #tpu.memory_space<vmem>>, vector<1x2x16xf32>,
    return
  }
  func.func @transform_0(%arg0: i32) -> (i32, i32, i32) {
    %c0_i32 = arith.constant 0 : i32
    %c0_i32_0 = arith.constant 0 : i32
    %c0_i32_1 = arith.constant 0 : i32
    %c0_i32_2 = arith.constant 0 : i32
    return %c0_i32, %c0_i32_0, %c0_i32_1 : i32, i32, i32
  }
  func.func @transform_1(%arg0: i32) -> (i32, i32, i32) {
    %c0_i32 = arith.constant 0 : i32
    %c0_i32_0 = arith.constant 0 : i32
    %c0_i32_1 = arith.constant 0 : i32
    return %c0_i32, %c0_i32_0, %arg0 : i32, i32, i32
  }
  func.func @transform_2(%arg0: i32) -> (i32, i32, i32) {
    %c0_i32 = arith.constant 0 : i32
    %c0_i32_0 = arith.constant 0 : i32
    %c0_i32_1 = arith.constant 0 : i32
    return %c0_i32, %c0_i32_0, %arg0 : i32, i32, i32
  }
}

</mosaic_0001>

<bundles_post_ra>
// kernel: tpu_custom_call.1
= control target key start
LH: loop header
LB: loop body
LE: loop exit
PB: predicated region body
PF: predicated region fallthrough
CT: control target
= control target key end

     0   :  { %v97_v1 = vmov 0   ;;  %s131_s0 = inlined_call_operand.vmem [shape: f32[2,2,1], index: 0, kind: input, shape index: {}]   ;;  %s132_s1 = inlined_call_operand.vmem [shape: f32[2,2,16], index: 1, kind: input, shape index: {}]   ;;  %s133_s2 = inlined_call_operand.hbm [shape: f32[2,2,16], index: 2, kind: output, shape index: {}]  }
   0x1   :  { %v12_v0 = vld [vmem:[%s131_s0] sm:$0x3]  ;;  %74 = vset.pattern.permute.xlu0 %v97_v1 }
   0x2   :  { %7 = vsyncpa [#allocation3], 0  ;;  %20 = vperm.xlu0 %74, %v12_v0   ;;  %v68_v2 = vld [vmem:[%s131_s0 + $0x2] sm:$0x3]  ;;  %v35_v3 = vlaneseq  ;;  %v15_v9 = vld [vmem:[%s132_s1] sm:$0x3] }
   0x3   :  { %v69_v10 = vld [vmem:[%s132_s1 + $0x2] sm:$0x3]  ;;  %s98_s17 = smov [#allocation2]   ;;  %vm47_vm1 = vcmask 123904  }
   0x4   :  { %v36_v4 = vand.u32 127, %v35_v3  ;;  %s57_s18 = sshll.u32 %s98_s17, 4  ;;  %s58_s18 = int_to_ptr.vmem [resolvable:$true] %s57_s18 }
   0x5   :  { %s75_s0 = scalar_lea.vmem %s58_s18, 64  ;;  %p80_p1 = scmp.lt.s32.totalorder %s58_s18, %s58_s18 }
   0x6   :  { %26 = vperm.xlu0 %74, %v68_v2   ;;  %v39_v5 = vshra.s32 %v36_v4, 1  ;;  %v40_v6 = vshra.s32 %v36_v4, 3  ;;  %p76_p0 = scmp.ne.s32.totalorder %s58_s18, %s75_s0  ;;  %p81_p2 = scmp.lt.s32.totalorder %s75_s0, %s75_s0 }
   0x8   :  { %v41_v7 = vand.u32 %v40_v6, %v39_v5  ;;  %p82_p3 = por %p81_p2, %p80_p1 }
   0xa   :  { %v42_v11 = vand.u32 1, %v41_v7  ;;  %p83_p4 = pnand %p82_p3, %p76_p0 }
   0xc   :  { %vm43_vm0 = vcmp.ne.s32.totalorder %v42_v11, 0 }
  0x7d   :  { %v21_v8 = vpop.permute.xlu0 %20 }
  0x7e   :  { %v23_v13 = vmul.f32 %v21_v8, %v15_v9  ;;  %v32_v14 = vmul.f32 %v69_v10, %v21_v8 }
  0x81   :  { %v27_v12 = vpop.permute.xlu0 %26 }
  0x82   :  { %v29_v15 = vmul.f32 %v69_v10, %v27_v12  ;;  %v31_v16 = vmul.f32 %v27_v12, %v15_v9 }
  0x84   :  { %v30_v17 = vsub.f32 %v23_v13, %v29_v15  ;;  %v33_v18 = vadd.f32 %v32_v14, %v31_v16 }
  0x86   :  { %v46_v19 = vsel %vm43_vm0, %v30_v17, %v15_v9  ;;  %v49_v20 = vsel %vm43_vm0, %v33_v18, %v69_v10 }
  0x87   :  { %48 = vst.msk [vmem:[#allocation2] sm:$0x3] %vm47_vm1, %v46_v19  ;;  %51 = vst.msk [vmem:[#allocation2 + $0x2] sm:$0x3] %vm47_vm1, %v49_v20 }
  0x88   :  { %86 = shalt.err (!%p83_p4)
}
  0x89   :  { %s99_s1 = smov 32   ;;  %s100_s19 = smov 2  }
  0x8a   :  { %63 = dma.vmem_to_hbm [thread:$0]  %s58_s18, 64, %s133_s2, [#allocation3], %s99_s1, %s99_s1, %s100_s19  }
  0x8b   :  { %95 = dma.done.wait [#allocation3], 64  }
  0x8c   :  { %96 = vsyncadd [#allocation3], 4294967232 }
  0x8d   :  { %67 = vsyncpa [#allocation3], 1 }

</bundles_post_ra>
